<compile_context>
chip_gen: v7x
topology: tpu7x:2x2x1
jax: 0.10.0
libtpu: 0.0.40
codegen_flags: <defaults>
</compile_context>

<pallas_src>
import jax
import jax.numpy as jnp
from jax.experimental import pallas as pl
from jax.experimental.pallas import tpu as pltpu

LN_EPS = 1e-5      # torch.nn.LayerNorm default eps
LANE = 128

# Row layout of the packed vector slab (one (8, LANE) f32 vreg).
_R_B_IN, _R_LN1_G, _R_LN1_B, _R_B_ATTN, _R_B_OUT, _R_LNF_G, _R_LNF_B, _R_B_TAIL = range(8)


# ----------------------------------------------------------------------------
# helpers
# ----------------------------------------------------------------------------
def _layernorm(x, g, b, eps=LN_EPS):
    mu = jnp.mean(x, axis=-1, keepdims=True)
    var = jnp.mean((x - mu) ** 2, axis=-1, keepdims=True)
    return (x - mu) * jax.lax.rsqrt(var + eps) * g + b


def _round_up(n, m):
    return ((n + m - 1) // m) * m


# ----------------------------------------------------------------------------
# fused kernel:
#   metadata encoder (input_proj -> pre-LN -> len-1 MHA -> residual ->
#   output_proj -> final LN) -> attention fusion (len-1 MHA) + linear_main,
#   the last two pre-composed into a single (D, NCpad) matmul.
# ----------------------------------------------------------------------------
def _make_head_kernel(hd, d, ncp):
    def head_kernel(meta_ref, w_in_ref, w_attn_ref, w_out_ref, w_tail_ref,
                    vecs_ref, out_ref):
        f32, bf16 = jnp.float32, jnp.bfloat16

        vecs = vecs_ref[...]                                   # (8, LANE) f32 = 1 vreg
        b_in   = vecs[_R_B_IN:_R_B_IN + 1, :hd]
        ln1_g  = vecs[_R_LN1_G:_R_LN1_G + 1, :hd]
        ln1_b  = vecs[_R_LN1_B:_R_LN1_B + 1, :hd]
        b_attn = vecs[_R_B_ATTN:_R_B_ATTN + 1, :hd]
        b_out  = vecs[_R_B_OUT:_R_B_OUT + 1, :d]
        lnf_g  = vecs[_R_LNF_G:_R_LNF_G + 1, :d]
        lnf_b  = vecs[_R_LNF_B:_R_LNF_B + 1, :d]
        b_tail = vecs[_R_B_TAIL:_R_B_TAIL + 1, :ncp]

        meta = meta_ref[...].astype(bf16)                      # (TB, M)

        # --- MultiheadAttentionMetadataEncoder ------------------------------
        x0 = jnp.dot(meta, w_in_ref[...],
                     preferred_element_type=f32) + b_in        # (TB, Hd) f32
        xn = _layernorm(x0, ln1_g, ln1_b)                      # pre-norm (f32)
        attn = jnp.dot(xn.astype(bf16), w_attn_ref[...],
                       preferred_element_type=f32) + b_attn    # len-1 MHA
        x1 = x0 + attn                                         # residual (eval dropout)
        m = jnp.dot(x1.astype(bf16), w_out_ref[...],
                    preferred_element_type=f32) + b_out        # output_proj -> (TB, D)
        mn = _layernorm(m, lnf_g, lnf_b)                       # final LN (f32)

        # --- AttentionFusion + linear_main (composed, lane-dense output) ----
        out_ref[...] = jnp.dot(mn.astype(bf16), w_tail_ref[...],
                               preferred_element_type=f32) + b_tail

    return head_kernel


def fusion_head(metadata, cp, block_b=None):
    """Returns lane-padded logits of shape (B, NCpad); caller slices [:, :NC]."""
    B, M = metadata.shape
    hd = cp["w_in"].shape[1]
    d = cp["w_out"].shape[1]
    ncp = cp["w_tail"].shape[1]
    kernel = _make_head_kernel(hd, d, ncp)
    args = (metadata, cp["w_in"], cp["w_attn"], cp["w_out"], cp["w_tail"], cp["vecs"])
    out_shape = jax.ShapeDtypeStruct((B, ncp), jnp.float32)

    if block_b is None or block_b >= B:
        # Small batch: single invocation, no grid, no pipeline overhead.
        vmem = pl.BlockSpec(memory_space=pltpu.MemorySpace.VMEM)
        return pl.pallas_call(
            kernel,
            out_shape=out_shape,
            in_specs=[vmem] * len(args),
            out_specs=vmem,
        )(*args)

    # Large batch: tile the batch axis; weights stay resident (constant index).
    assert block_b % 8 == 0 and B % block_b == 0

    def _const_spec(a):
        nd = a.ndim
        return pl.BlockSpec(a.shape, lambda i, _nd=nd: (0,) * _nd)

    in_specs = [pl.BlockSpec((block_b, M), lambda i: (i, 0))] + \
               [_const_spec(a) for a in args[1:]]
    out_specs = pl.BlockSpec((block_b, ncp), lambda i: (i, 0))
    return pl.pallas_call(
        kernel,
        out_shape=out_shape,
        grid=(B // block_b,),
        in_specs=in_specs,
        out_specs=out_specs,
        compiler_params=pltpu.CompilerParams(dimension_semantics=("parallel",)),
    )(*args)


# ----------------------------------------------------------------------------
# full forward (post-backbone).  feature_maps is accepted only to mirror the
# PyTorch interface; the forward output does not depend on it (see header).
# ----------------------------------------------------------------------------
def custom_model_forward(feature_maps, metadata, composed_params, num_classes,
                         block_b=None):
    del feature_maps
    padded = fusion_head(metadata, composed_params, block_b=block_b)
    return padded[:, :num_classes]


# ----------------------------------------------------------------------------
# deterministic synthetic parameters (PyTorch-style uniform init) + one-time
# host-side composition / packing.
# ----------------------------------------------------------------------------
def init_params(key, M, Hd, D, NC):
    ks = jax.random.split(key, 14)
    f32 = jnp.float32

    def u(k, shape, fan_in):
        bound = 1.0 / (fan_in ** 0.5)
        return jax.random.uniform(k, shape, f32, -bound, bound)

    return {
        # MultiheadAttentionMetadataEncoder
        "w_in":  u(ks[0], (M, Hd), M),   "b_in":  u(ks[1], (1, Hd), M),
        "ln1_g": jnp.ones((1, Hd), f32), "ln1_b": jnp.zeros((1, Hd), f32),
        "wv1":   u(ks[2], (Hd, Hd), Hd), "bv1":   u(ks[3], (1, Hd), Hd),
        "wo1":   u(ks[4], (Hd, Hd), Hd), "bo1":   u(ks[5], (1, Hd), Hd),
        "w_out": u(ks[6], (Hd, D), Hd),  "b_out": u(ks[7], (1, D), Hd),
        "lnf_g": jnp.ones((1, D), f32),  "lnf_b": jnp.zeros((1, D), f32),
        # AttentionFusion (value / out projections)
        "wv2":   u(ks[8], (D, D), D),    "bv2":   u(ks[9], (1, D), D),
        "wo2":   u(ks[10], (D, D), D),   "bo2":   u(ks[11], (1, D), D),
        # linear_main
        "wm":    u(ks[12], (D, NC), D),  "bm":    u(ks[13], (1, NC), D),
    }


def compose_params(p):
    """One-time host-side composition of chained linears + operand packing."""
    f32, bf16 = jnp.float32, jnp.bfloat16
    hd = p["w_in"].shape[1]
    d, nc = p["wm"].shape
    ncp = _round_up(nc, LANE)                      # lane-dense output width
    lane = _round_up(max(hd, d, ncp), LANE)        # slab lane width

    # metadata-encoder MHA (len-1): out_proj(v_proj(.))
    w_attn = p["wv1"] @ p["wo1"]
    b_attn = p["bv1"] @ p["wo1"] + p["bo1"]
    # fusion MHA (len-1) + linear_main
    w_fuse = p["wv2"] @ p["wo2"]
    b_fuse = p["bv2"] @ p["wo2"] + p["bo2"]
    w_tail = w_fuse @ p["wm"]                      # (D, NC)
    b_tail = b_fuse @ p["wm"] + p["bm"]            # (1, NC)

    w_tail_p = jnp.zeros((d, ncp), f32).at[:, :nc].set(w_tail)

    slab = jnp.zeros((8, lane), f32)
    slab = slab.at[_R_B_IN,   :hd].set(p["b_in"][0])
    slab = slab.at[_R_LN1_G,  :hd].set(p["ln1_g"][0])
    slab = slab.at[_R_LN1_B,  :hd].set(p["ln1_b"][0])
    slab = slab.at[_R_B_ATTN, :hd].set(b_attn[0])
    slab = slab.at[_R_B_OUT,  :d].set(p["b_out"][0])
    slab = slab.at[_R_LNF_G,  :d].set(p["lnf_g"][0])
    slab = slab.at[_R_LNF_B,  :d].set(p["lnf_b"][0])
    slab = slab.at[_R_B_TAIL, :nc].set(b_tail[0])

    return {
        # bf16 weights -> MXU-native matmuls, half the weight DMA bytes
        "w_in":   p["w_in"].astype(bf16),
        "w_attn": w_attn.astype(bf16),
        "w_out":  p["w_out"].astype(bf16),
        "w_tail": w_tail_p.astype(bf16),
        # packed vectors stay f32 (LN / bias math in f32)
        "vecs":   slab,
    }


# ----------------------------------------------------------------------------
# pure-JAX f32 reference of the original (un-composed) computation
# ----------------------------------------------------------------------------
def reference_forward(metadata, p):
    x0 = metadata @ p["w_in"] + p["b_in"]
    xn = _layernorm(x0, p["ln1_g"], p["ln1_b"])
    attn1 = (xn @ p["wv1"] + p["bv1"]) @ p["wo1"] + p["bo1"]
    x1 = x0 + attn1
    m = x1 @ p["w_out"] + p["b_out"]
    mn = _layernorm(m, p["lnf_g"], p["lnf_b"])
    fused = (mn @ p["wv2"] + p["bv2"]) @ p["wo2"] + p["bo2"]
    logits = fused @ p["wm"] + p["bm"]
    acc = 0.0
    for _ in range(5):                     # eval-mode dropout = identity
        acc = acc + logits
    return acc / 5.0


if __name__ == "__main__":
    key = jax.random.PRNGKey(0)
    B, C, H, W = 2, 128, 8, 8        # C == encoder.num_features
    M, Hd, NC = 16, 64, 10           # use_metadata_num, metadata_dim, num_classes

    k_img, k_meta, k_par, k_meta2 = jax.random.split(key, 4)
    # backbone feature-map stand-in for self.features(images); logits are
    # provably independent of it (see header).
    feature_maps = jax.random.normal(k_img, (B, C, H, W), jnp.float32)
    metadata = jax.random.normal(k_meta, (B, M), jnp.float32)

    params = init_params(k_par, M, Hd, C, NC)
    composed = compose_params(params)        # one-time host-side composition

    # Path 1: small batch -> single no-grid pallas_call.
    out = custom_model_forward(feature_maps, metadata, composed, NC)
    jax.block_until_ready(out)
    assert out.shape == (B, NC) and out.dtype == jnp.float32
    ref = reference_forward(metadata, params)
    assert jnp.allclose(out, ref, rtol=2e-2, atol=2e-2), "small-batch mismatch"

    # Path 2: larger batch -> batch-tiled grid with a "parallel" axis
    # (sharded across both TensorCores on v7x).
    B2 = 32
    metadata2 = jax.random.normal(k_meta2, (B2, M), jnp.float32)
    out2 = fusion_head(metadata2, composed, block_b=8)[:, :NC]
    jax.block_until_ready(out2)
    ref2 = reference_forward(metadata2, params)
    assert out2.shape == (B2, NC)
    assert jnp.allclose(out2, ref2, rtol=2e-2, atol=2e-2), "batched mismatch"

    print("KERNEL_OK")
</pallas_src>

<mosaic_0001>
module attributes {stable_mosaic.version = 11 : i64} {
  func.func @head_kernel(%arg0: memref<2x16xf32, #tpu.memory_space<vmem>>, %arg1: memref<16x64xbf16, #tpu.memory_space<vmem>>, %arg2: memref<64x64xbf16, #tpu.memory_space<vmem>>, %arg3: memref<64x128xbf16, #tpu.memory_space<vmem>>, %arg4: memref<128x128xbf16, #tpu.memory_space<vmem>>, %arg5: memref<8x128xf32, #tpu.memory_space<vmem>>, %arg6: memref<2x128xf32, #tpu.memory_space<vmem>>) attributes {dimension_semantics = [], scalar_prefetch = 0 : i64, scratch_operands = 0 : i64, tpu.core_type = #tpu.core_type<tc>} {
    %c0 = arith.constant 0 : index
    %c0_0 = arith.constant 0 : index
    %0 = vector.load %arg5[%c0, %c0_0] : memref<8x128xf32, #tpu.memory_space<vmem>>, vector<8x128xf32>
    %1 = vector.extract_strided_slice %0 {offsets = [0, 0], sizes = [1, 64], strides = [1, 1]} : vector<8x128xf32> to vector<1x64xf32>
    %2 = vector.extract_strided_slice %0 {offsets = [1, 0], sizes = [1, 64], strides = [1, 1]} : vector<8x128xf32> to vector<1x64xf32>
    %3 = vector.extract_strided_slice %0 {offsets = [2, 0], sizes = [1, 64], strides = [1, 1]} : vector<8x128xf32> to vector<1x64xf32>
    %4 = vector.extract_strided_slice %0 {offsets = [3, 0], sizes = [1, 64], strides = [1, 1]} : vector<8x128xf32> to vector<1x64xf32>
    %5 = vector.extract_strided_slice %0 {offsets = [4, 0], sizes = [1, 128], strides = [1, 1]} : vector<8x128xf32> to vector<1x128xf32>
    %6 = vector.extract_strided_slice %0 {offsets = [5, 0], sizes = [1, 128], strides = [1, 1]} : vector<8x128xf32> to vector<1x128xf32>
    %7 = vector.extract_strided_slice %0 {offsets = [6, 0], sizes = [1, 128], strides = [1, 1]} : vector<8x128xf32> to vector<1x128xf32>
    %8 = vector.extract_strided_slice %0 {offsets = [7, 0], sizes = [1, 128], strides = [1, 1]} : vector<8x128xf32> to vector<1x128xf32>
    %c0_1 = arith.constant 0 : index
    %c0_2 = arith.constant 0 : index
    %9 = vector.load %arg0[%c0_1, %c0_2] : memref<2x16xf32, #tpu.memory_space<vmem>>, vector<2x16xf32>
    %10 = arith.truncf %9 : vector<2x16xf32> to vector<2x16xbf16>
    %c0_3 = arith.constant 0 : index
    %c0_4 = arith.constant 0 : index
    %11 = vector.load %arg1[%c0_3, %c0_4] : memref<16x64xbf16, #tpu.memory_space<vmem>>, vector<16x64xbf16>
    %cst = arith.constant dense<0.000000e+00> : vector<2x64xf32>
    %12 = tpu.matmul %10, %11, %cst {dimension_numbers = #tpu.dot_dimension_numbers<[1], [0], [0], [1], [0, 0, 1, 1], [], []>} : vector<2x16xbf16>, vector<16x64xbf16>, vector<2x64xf32> -> vector<2x64xf32>
    %13 = vector.broadcast %1 : vector<1x64xf32> to vector<2x64xf32>
    %14 = arith.addf %12, %13 : vector<2x64xf32>
    %cst_5 = arith.constant dense<0.000000e+00> : vector<2xf32>
    %15 = vector.multi_reduction <add>, %14, %cst_5 [1] : vector<2x64xf32> to vector<2xf32>
    %16 = vector.shape_cast %15 : vector<2xf32> to vector<2x1xf32>
    %cst_6 = arith.constant 6.400000e+01 : f32
    %17 = vector.broadcast %cst_6 : f32 to vector<2x1xf32>
    %18 = arith.divf %16, %17 : vector<2x1xf32>
    %19 = vector.broadcast %18 : vector<2x1xf32> to vector<2x64xf32>
    %20 = arith.subf %14, %19 : vector<2x64xf32>
    %21 = arith.mulf %20, %20 : vector<2x64xf32>
    %cst_7 = arith.constant dense<0.000000e+00> : vector<2xf32>
    %22 = vector.multi_reduction <add>, %21, %cst_7 [1] : vector<2x64xf32> to vector<2xf32>
    %23 = vector.shape_cast %22 : vector<2xf32> to vector<2x1xf32>
    %cst_8 = arith.constant 6.400000e+01 : f32
    %24 = vector.broadcast %cst_8 : f32 to vector<2x1xf32>
    %25 = arith.divf %23, %24 : vector<2x1xf32>
    %26 = vector.broadcast %18 : vector<2x1xf32> to vector<2x64xf32>
    %27 = arith.subf %14, %26 : vector<2x64xf32>
    %cst_9 = arith.constant 9.99999974E-6 : f32
    %28 = vector.broadcast %cst_9 : f32 to vector<2x1xf32>
    %29 = arith.addf %25, %28 : vector<2x1xf32>
    %30 = math.rsqrt %29 : vector<2x1xf32>
    %31 = vector.broadcast %30 : vector<2x1xf32> to vector<2x64xf32>
    %32 = arith.mulf %27, %31 : vector<2x64xf32>
    %33 = vector.broadcast %2 : vector<1x64xf32> to vector<2x64xf32>
    %34 = arith.mulf %32, %33 : vector<2x64xf32>
    %35 = vector.broadcast %3 : vector<1x64xf32> to vector<2x64xf32>
    %36 = arith.addf %34, %35 : vector<2x64xf32>
    %37 = arith.truncf %36 : vector<2x64xf32> to vector<2x64xbf16>
    %c0_10 = arith.constant 0 : index
    %c0_11 = arith.constant 0 : index
    %38 = vector.load %arg2[%c0_10, %c0_11] : memref<64x64xbf16, #tpu.memory_space<vmem>>, vector<64x64xbf16>
    %cst_12 = arith.constant dense<0.000000e+00> : vector<2x64xf32>
    %39 = tpu.matmul %37, %38, %cst_12 {dimension_numbers = #tpu.dot_dimension_numbers<[1], [0], [0], [1], [0, 0, 1, 1], [], []>} : vector<2x64xbf16>, vector<64x64xbf16>, vector<2x64xf32> -> vector<2x64xf32>
    %40 = vector.broadcast %4 : vector<1x64xf32> to vector<2x64xf32>
    %41 = arith.addf %39, %40 : vector<2x64xf32>
    %42 = arith.addf %14, %41 : vector<2x64xf32>
    %43 = arith.truncf %42 : vector<2x64xf32> to vector<2x64xbf16>
    %c0_13 = arith.constant 0 : index
    %c0_14 = arith.constant 0 : index
    %44 = vector.load %arg3[%c0_13, %c0_14] : memref<64x128xbf16, #tpu.memory_space<vmem>>, vector<64x128xbf16>
    %cst_15 = arith.constant dense<0.000000e+00> : vector<2x128xf32>
    %45 = tpu.matmul %43, %44, %cst_15 {dimension_numbers = #tpu.dot_dimension_numbers<[1], [0], [0], [1], [0, 0, 1, 1], [], []>} : vector<2x64xbf16>, vector<64x128xbf16>, vector<2x128xf32> -> vector<2x128xf32>
    %46 = vector.broadcast %5 : vector<1x128xf32> to vector<2x128xf32>
    %47 = arith.addf %45, %46 : vector<2x128xf32>
    %cst_16 = arith.constant dense<0.000000e+00> : vector<2xf32>
    %48 = vector.multi_reduction <add>, %47, %cst_16 [1] : vector<2x128xf32> to vector<2xf32>
    %49 = vector.shape_cast %48 : vector<2xf32> to vector<2x1xf32>
    %cst_17 = arith.constant 1.280000e+02 : f32
    %50 = vector.broadcast %cst_17 : f32 to vector<2x1xf32>
    %51 = arith.divf %49, %50 : vector<2x1xf32>
    %52 = vector.broadcast %51 : vector<2x1xf32> to vector<2x128xf32>
    %53 = arith.subf %47, %52 : vector<2x128xf32>
    %54 = arith.mulf %53, %53 : vector<2x128xf32>
    %cst_18 = arith.constant dense<0.000000e+00> : vector<2xf32>
    %55 = vector.multi_reduction <add>, %54, %cst_18 [1] : vector<2x128xf32> to vector<2xf32>
    %56 = vector.shape_cast %55 : vector<2xf32> to vector<2x1xf32>
    %cst_19 = arith.constant 1.280000e+02 : f32
    %57 = vector.broadcast %cst_19 : f32 to vector<2x1xf32>
    %58 = arith.divf %56, %57 : vector<2x1xf32>
    %59 = vector.broadcast %51 : vector<2x1xf32> to vector<2x128xf32>
    %60 = arith.subf %47, %59 : vector<2x128xf32>
    %cst_20 = arith.constant 9.99999974E-6 : f32
    %61 = vector.broadcast %cst_20 : f32 to vector<2x1xf32>
    %62 = arith.addf %58, %61 : vector<2x1xf32>
    %63 = math.rsqrt %62 : vector<2x1xf32>
    %64 = vector.broadcast %63 : vector<2x1xf32> to vector<2x128xf32>
    %65 = arith.mulf %60, %64 : vector<2x128xf32>
    %66 = vector.broadcast %6 : vector<1x128xf32> to vector<2x128xf32>
    %67 = arith.mulf %65, %66 : vector<2x128xf32>
    %68 = vector.broadcast %7 : vector<1x128xf32> to vector<2x128xf32>
    %69 = arith.addf %67, %68 : vector<2x128xf32>
    %70 = arith.truncf %69 : vector<2x128xf32> to vector<2x128xbf16>
    %c0_21 = arith.constant 0 : index
    %c0_22 = arith.constant 0 : index
    %71 = vector.load %arg4[%c0_21, %c0_22] : memref<128x128xbf16, #tpu.memory_space<vmem>>, vector<128x128xbf16>
    %cst_23 = arith.constant dense<0.000000e+00> : vector<2x128xf32>
    %72 = tpu.matmul %70, %71, %cst_23 {dimension_numbers = #tpu.dot_dimension_numbers<[1], [0], [0], [1], [0, 0, 1, 1], [], []>} : vector<2x128xbf16>, vector<128x128xbf16>, vector<2x128xf32> -> vector<2x128xf32>
    %73 = vector.broadcast %8 : vector<1x128xf32> to vector<2x128xf32>
    %74 = arith.addf %72, %73 : vector<2x128xf32>
    %c0_24 = arith.constant 0 : index
    %c0_25 = arith.constant 0 : index
    %75 = vector.load %arg6[%c0_24, %c0_25] : memref<2x128xf32, #tpu.memory_space<vmem>>, vector<2x128xf32>
    tpu.vector_store %arg6[%c0_24, %c0_25], %74 {strides = array<i32>} : memref<2x128xf32, #tpu.memory_space<vmem>>, vector<2x128xf32>,
    return
  }
}

</mosaic_0001>

<bundles_post_ra>
// kernel: tpu_custom_call.1
= control target key start
LH: loop header
LB: loop body
LE: loop exit
PB: predicated region body
PF: predicated region fallthrough
CT: control target
= control target key end

     0   :  { %11 = vsyncpa [#allocation3], 0  ;;  %s932_s0 = inlined_call_operand.hbm [shape: f32[2,16], index: 0, kind: input, shape index: {}]   ;;  %s933_s1 = inlined_call_operand.hbm [shape: bf16[16,64], index: 1, kind: input, shape index: {}]   ;;  %s934_s2 = inlined_call_operand.hbm [shape: bf16[64,64], index: 2, kind: input, shape index: {}]   ;;  %s935_s3 = inlined_call_operand.hbm [shape: bf16[64,128], index: 3, kind: input, shape index: {}]   ;;  %s936_s4 = inlined_call_operand.hbm [shape: bf16[128,128], index: 4, kind: input, shape index: {}]   ;;  %s937_s5 = inlined_call_operand.vmem [shape: f32[8,128], index: 5, kind: input, shape index: {}]   ;;  %s938_s6 = inlined_call_operand.hbm [shape: f32[2,128], index: 6, kind: output, shape index: {}]  }
   0x1   :  { %12 = vsyncpa [#allocation6], 0 }
   0x2   :  { %13 = vsyncpa [#allocation9], 0 }
   0x3   :  { %14 = vsyncpa [#allocation4], 0  ;;  %s751_s21 = smov [#allocation5]   ;;  %s611_s25 = scalar_lea.hbm %s933_s1, 128 }
   0x4   :  { %s30_s22 = sshll.u32 %s751_s21, 4  ;;  %p612_p0 = scmp.ne.s32.totalorder %s933_s1, %s611_s25  ;;  %s31_s22 = int_to_ptr.vmem [resolvable:$true] %s30_s22 }
   0x5   :  { %p615_p1 = scmp.lt.u32.totalorder %s611_s25, %s933_s1 }
   0x7   :  { %p617_p2 = pnand %p615_p1, %p612_p0 }
   0x9   :  { %620 = shalt.err (!%p617_p2)
}
   0xa   :  { %s621_s30 = scalar_lea.vmem %s31_s22, 128  ;;  %p626_p4 = scmp.lt.s32.totalorder %s31_s22, %s31_s22 }
   0xb   :  { %p622_p3 = scmp.ne.s32.totalorder %s31_s22, %s621_s30  ;;  %p627_p5 = scmp.lt.s32.totalorder %s621_s30, %s621_s30 }
   0xd   :  { %p628_p6 = por %p627_p5, %p626_p4 }
   0xf   :  { %p629_p7 = pnand %p628_p6, %p622_p3 }
  0x11   :  { %632 = shalt.err (!%p629_p7)
}
  0x12   :  { %s752_s7 = smov 64   ;;  %s753_s8 = smov 4  }
  0x13   :  { %36 = dma.hbm_to_vmem [thread:$0]  %s933_s1, 128, %s31_s22, [#allocation6], %s752_s7, %s752_s7, %s753_s8  }
  0x14   :  { %s754_s11 = smov [#allocation8]   ;;  %s755_s13 = smov [#allocation2]  }
  0x15   :  { %s54_s12 = sshll.u32 %s754_s11, 4  ;;  %s21_s14 = sshll.u32 %s755_s13, 4  ;;  %s55_s12 = int_to_ptr.vmem [resolvable:$true] %s54_s12  ;;  %s22_s14 = int_to_ptr.vmem [resolvable:$true] %s21_s14 }
  0x16   :  { %s633_s17 = scalar_lea.hbm %s935_s3, 512 }
  0x17   :  { %p634_p8 = scmp.ne.s32.totalorder %s935_s3, %s633_s17  ;;  %p637_p9 = scmp.lt.u32.totalorder %s633_s17, %s935_s3 }
  0x19   :  { %p639_p10 = pnand %p637_p9, %p634_p8 }
  0x1b   :  { %642 = shalt.err (!%p639_p10)
}
  0x1c   :  { %s643_s1 = scalar_lea.vmem %s55_s12, 512  ;;  %p648_p12 = scmp.lt.s32.totalorder %s55_s12, %s55_s12 }
  0x1d   :  { %p644_p11 = scmp.ne.s32.totalorder %s55_s12, %s643_s1  ;;  %p649_p13 = scmp.lt.s32.totalorder %s643_s1, %s643_s1 }
  0x1f   :  { %p650_p0 = por %p649_p13, %p648_p12 }
  0x21   :  { %p651_p1 = pnand %p650_p0, %p644_p11 }
  0x23   :  { %654 = shalt.err (!%p651_p1)
}
  0x24   :  { %60 = dma.hbm_to_vmem [thread:$0]  %s935_s3, 512, %s55_s12, [#allocation9], %s752_s7, %s752_s7, %s753_s8  }
  0x25   :  { %s655_s26 = scalar_lea.hbm %s932_s0, 32 }
  0x26   :  { %p656_p2 = scmp.ne.s32.totalorder %s932_s0, %s655_s26  ;;  %p659_p3 = scmp.lt.u32.totalorder %s655_s26, %s932_s0 }
  0x28   :  { %p661_p4 = pnand %p659_p3, %p656_p2 }
  0x2a   :  { %664 = shalt.err (!%p661_p4)
}
  0x2b   :  { %s665_s9 = scalar_lea.vmem %s22_s14, 32  ;;  %p670_p6 = scmp.lt.s32.totalorder %s22_s14, %s22_s14 }
  0x2c   :  { %p666_p5 = scmp.ne.s32.totalorder %s22_s14, %s665_s9  ;;  %p671_p7 = scmp.lt.s32.totalorder %s665_s9, %s665_s9 }
  0x2e   :  { %p672_p8 = por %p671_p7, %p670_p6 }
  0x30   :  { %p673_p9 = pnand %p672_p8, %p666_p5 }
  0x32   :  { %676 = shalt.err (!%p673_p9)
}
  0x33   :  { %24 = dma.hbm_to_vmem [thread:$0]  %s932_s0, 32, %s22_s14, [#allocation3]  }
  0x34   :  { %s756_s11 = smov [#allocation7]   ;;  %s757_s13 = smov [#allocation10]  }
  0x35   :  { %s42_s12 = sshll.u32 %s756_s11, 4  ;;  %s66_s15 = sshll.u32 %s757_s13, 4  ;;  %s43_s12 = int_to_ptr.vmem [resolvable:$true] %s42_s12  ;;  %s67_s15 = int_to_ptr.vmem [resolvable:$true] %s66_s15 }
  0x36   :  { %s677_s18 = scalar_lea.hbm %s934_s2, 512 }
  0x37   :  { %p678_p10 = scmp.ne.s32.totalorder %s934_s2, %s677_s18  ;;  %p681_p11 = scmp.lt.u32.totalorder %s677_s18, %s934_s2 }
  0x39   :  { %p683_p12 = pnand %p681_p11, %p678_p10 }
  0x3b   :  { %686 = shalt.err (!%p683_p12)
}
  0x3c   :  { %s687_s0 = scalar_lea.vmem %s43_s12, 512  ;;  %p692_p0 = scmp.lt.s32.totalorder %s43_s12, %s43_s12 }
  0x3d   :  { %p688_p13 = scmp.ne.s32.totalorder %s43_s12, %s687_s0  ;;  %p693_p1 = scmp.lt.s32.totalorder %s687_s0, %s687_s0 }
  0x3f   :  { %p694_p2 = por %p693_p1, %p692_p0 }
  0x41   :  { %p695_p3 = pnand %p694_p2, %p688_p13 }
  0x43   :  { %698 = shalt.err (!%p695_p3)
}
  0x44   :  { %48 = dma.hbm_to_vmem [thread:$0]  %s934_s2, 512, %s43_s12, [#allocation6], %s752_s7, %s752_s7, %s753_s8  }
  0x45   :  { %s699_s25 = scalar_lea.hbm %s936_s4, 1024 }
  0x46   :  { %p700_p4 = scmp.ne.s32.totalorder %s936_s4, %s699_s25  ;;  %p703_p5 = scmp.lt.u32.totalorder %s699_s25, %s936_s4 }
  0x48   :  { %p705_p6 = pnand %p703_p5, %p700_p4 }
  0x4a   :  { %708 = shalt.err (!%p705_p6)
}
  0x4b   :  { %s709_s30 = scalar_lea.vmem %s67_s15, 1024  ;;  %p714_p8 = scmp.lt.s32.totalorder %s67_s15, %s67_s15 }
  0x4c   :  { %p710_p7 = scmp.ne.s32.totalorder %s67_s15, %s709_s30  ;;  %p715_p9 = scmp.lt.s32.totalorder %s709_s30, %s709_s30 }
  0x4e   :  { %p716_p10 = por %p715_p9, %p714_p8 }
  0x50   :  { %p717_p11 = pnand %p716_p10, %p710_p7 }
  0x52   :  { %720 = shalt.err (!%p717_p11)
}
  0x53   :  { %72 = dma.hbm_to_vmem [thread:$0]  %s936_s4, 1024, %s67_s15, [#allocation9], %s752_s7, %s752_s7, %s753_s8  }
  0x54   :  { %743 = dma.done.wait [#allocation3], 32  }
  0x55   :  { %744 = vsyncadd [#allocation3], 4294967264 }
  0x56   :  { %745 = dma.done.wait [#allocation6], 640  }
  0x57   :  { %746 = vsyncadd [#allocation6], 4294966656 }
  0x58   :  { %747 = dma.done.wait [#allocation9], 1536  }
  0x59   :  { %748 = vsyncadd [#allocation9], 4294965760  ;;  %v758_v0 = vmov 0.0   ;;  %vm759_vm0 = vmmov 0   ;;  %v590_v1 = vld [vmem:[#allocation5] sm:$0xff]   ;;  %vm106_vm1 = vcmask 130048   ;;  %v96_v4 = vlaneseq }
  0x5a   :  { %530 = vmatprep.subr.bf16.mxu0 %v758_v0  ;;  %532 = vmatprep.mubr.msk.bf16.mxu0 %vm759_vm0, %v758_v0  ;;  %v92_v2 = vld [vmem:[#allocation2] sm:$0x3]  ;;  %v883_v7 = vld [vmem:[%s937_s5] sm:$0xff]  ;;  %vm150_vm2 = vcmask 517120   ;;  %v591_v20 = vld [vmem:[#allocation7] sm:$0xff]   ;;  %vm212_vm3 = vcmask 523264  }
  0x5b   :  { %560 = vmatprep.subr.bf16.mxu1 %v758_v0  ;;  %576 = vmatprep.mubr.msk.bf16.mxu1 %vm759_vm0, %v758_v0  ;;  %v93_v3 = vpack.c.bf16 %v92_v2, %v92_v2  ;;  %v877_v5 = vshrl.u32 %v96_v4, 7  ;;  %v592_v21 = vld [vmem:[#allocation7 + $0x8] sm:$0xff]   ;;  %v593_v22 = vld [vmem:[#allocation7 + $0x10] sm:$0xff]   ;;  %v594_v23 = vld [vmem:[#allocation7 + $0x18] sm:$0xff]   ;;  %vm337_vm4 = vcmask 1041408   ;;  %s760_s5 = smov [#allocation11]  }
  0x5c   :  { %531 = vmatpush3.bf16.msra.mxu0 %v590_v1  ;;  %v595_v35 = vld [vmem:[#allocation8] sm:$0xff]   ;;  %v596_v37 = vld [vmem:[#allocation8 + $0x8] sm:$0xff]   ;;  %v597_v38 = vld [vmem:[#allocation8 + $0x10] sm:$0xff]   ;;  %s478_s8 = sshll.u32 %s760_s5, 4  ;;  %s479_s8 = int_to_ptr.vmem [resolvable:$true] %s478_s8 }
  0x5d   :  { %536 = vmatprep.subr.bf16.mxu0 %v758_v0  ;;  %v98_v6 = vsub.s32 0, %v877_v5  ;;  %v167_v27 = vsub.s32 1, %v877_v5  ;;  %v172_v28 = vsub.s32 2, %v877_v5  ;;  %v598_v39 = vld [vmem:[#allocation8 + $0x18] sm:$0xff]   ;;  %v186_v40 = vsub.s32 3, %v877_v5  ;;  %v599_v57 = vld [vmem:[#allocation10] sm:$0xff]   ;;  %p726_p13 = scmp.lt.s32.totalorder %s479_s8, %s479_s8 }
  0x5e   :  { %v268_v49 = vsub.s32 4, %v877_v5  ;;  %561 = vmatpush3.bf16.msra.mxu1 %v599_v57  ;;  %v600_v58 = vld [vmem:[#allocation10 + $0x8] sm:$0xff]   ;;  %v601_v1 = vld [vmem:[#allocation10 + $0x10] sm:$0xff]   ;;  %v602_v2 = vld [vmem:[#allocation10 + $0x18] sm:$0xff]   ;;  %s721_s3 = scalar_lea.vmem %s479_s8, 32 }
  0x5f   :  { %533 = vmatmul.mubr.msk.bf16.vlgmr.msra.gmra.mrb[0].mxu0 %vm106_vm1, %v93_v3  ;;  %v99_v8 = vrot.slane %v883_v7, %v98_v6  ;;  %v168_v29 = vrot.slane %v883_v7, %v167_v27  ;;  %v173_v32 = vrot.slane %v883_v7, %v172_v28  ;;  %v187_v41 = vrot.slane %v883_v7, %v186_v40  ;;  %v603_v3 = vld [vmem:[#allocation10 + $0x20] sm:$0xff]   ;;  %v604_v4 = vld [vmem:[#allocation10 + $0x28] sm:$0xff]   ;;  %v605_v6 = vld [vmem:[#allocation10 + $0x30] sm:$0xff]   ;;  %p722_p12 = scmp.ne.s32.totalorder %s479_s8, %s721_s3  ;;  %p727_p0 = scmp.lt.s32.totalorder %s721_s3, %s721_s3 }
  0x60   :  { %544 = vmatprep.mubr.msk.bf16.mxu0 %vm759_vm0, %v758_v0  ;;  %537 = vmatpush3.bf16.msra.mxu0 %v591_v20  ;;  %v269_v50 = vrot.slane %v883_v7, %v268_v49 }
  0x61   :  { %538 = vmatprep.subr.bf16.mxu0 %v758_v0  ;;  %562 = vmatprep.subr.bf16.mxu1 %v758_v0  ;;  %p728_p1 = por %p727_p0, %p726_p13 }
  0x62   :  { %563 = vmatpush3.bf16.msra.mxu1 %v600_v58 }
  0x63   :  { %564 = vmatprep.subr.bf16.mxu1 %v758_v0  ;;  %p729_p2 = pnand %p728_p1, %p722_p12 }
  0x64   :  { %539 = vmatpush3.bf16.msra.mxu0 %v592_v21 }
  0x65   :  { %540 = vmatprep.subr.bf16.mxu0 %v758_v0 }
  0x66   :  { %565 = vmatpush3.bf16.msra.mxu1 %v601_v1 }
  0x67   :  { %566 = vmatprep.subr.bf16.mxu1 %v758_v0 }
  0x68   :  { %541 = vmatpush3.bf16.msra.mxu0 %v593_v22 }
  0x69   :  { %542 = vmatprep.subr.bf16.mxu0 %v758_v0 }
  0x6a   :  { %567 = vmatpush3.bf16.msra.mxu1 %v602_v2 }
  0x6b   :  { %568 = vmatprep.subr.bf16.mxu1 %v758_v0 }
  0x6c   :  { %543 = vmatpush3.bf16.msra.mxu0 %v594_v23 }
  0x6d   :  { %548 = vmatprep.subr.bf16.mxu0 %v758_v0 }
  0x6e   :  { %569 = vmatpush3.bf16.msra.mxu1 %v603_v3 }
  0x6f   :  { %570 = vmatprep.subr.bf16.mxu1 %v758_v0 }
  0x72   :  { %571 = vmatpush3.bf16.msra.mxu1 %v604_v4 }
  0x73   :  { %572 = vmatprep.subr.bf16.mxu1 %v758_v0 }
  0x76   :  { %573 = vmatpush3.bf16.msra.mxu1 %v605_v6 }
  0x77   :  { %574 = vmatprep.subr.bf16.mxu1 %v758_v0 }
 0x132   :  { %v144_v9 = vpop.f32.mrb[0].mxu0 }
 0x133   :  { %v145_v10 = vadd.f32 %v144_v9, %v99_v8  ;;  %v534_v11 = vpop.f32.mrb[1].mxu0  ;;  %v606_v8 = vld [vmem:[#allocation10 + $0x38] sm:$0xff]  }
 0x134   :  { %v147_v12 = vpop.f32.mrb[2].mxu0  ;;  %575 = vmatpush3.bf16.msra.mxu1 %v606_v8 }
 0x135   :  { %v535_v13 = vpop.f32.mrb[3].mxu0  ;;  %v151_v14 = vsel %vm150_vm2, %v145_v10, 0.0  ;;  %v354_v12 = vsub.s32 5, %v877_v5 }
 0x136   :  { %152 = vadd.xlane.f32.xlu0 %v151_v14  ;;  %v359_v13 = vsub.s32 6, %v877_v5 }
 0x137   :  { %v355_v14 = vrot.slane %v883_v7, %v354_v12 }
 0x1c3   :  { %v153_v15 = vpop.xlane.xlu0 %152 }
 0x1c4   :  { %v155_v16 = vmul.f32 0.015625, %v153_v15 }
 0x1c6   :  { %v156_v17 = vsub.f32 %v145_v10, %v155_v16 }
 0x1c8   :  { %v157_v18 = vmul.f32 %v156_v17, %v156_v17 }
 0x1ca   :  { %v158_v19 = vsel %vm150_vm2, %v157_v18, 0.0 }
 0x1cb   :  { %159 = vadd.xlane.f32.xlu0 %v158_v19 }
 0x258   :  { %v160_v24 = vpop.xlane.xlu0 %159 }
 0x259   :  { %v161_v25 = vmul.f32 0.015625, %v160_v24 }
 0x25b   :  { %v162_v26 = vadd.f32 1e-05, %v161_v25 }
 0x25d   :  { %607 = vrsqrt.f32 %v162_v26 }
 0x267   :  { %v608_v30 = vpop.eup %607 }
 0x268   :  { %v164_v31 = vmul.f32 %v608_v30, %v156_v17  ;;  %v360_v17 = vrot.slane %v883_v7, %v359_v13 }
 0x26a   :  { %v169_v33 = vmul.f32 %v168_v29, %v164_v31 }
 0x26c   :  { %v174_v34 = vadd.f32 %v173_v32, %v169_v33 }
 0x26e   :  { %v175_v36 = vpack.c.bf16 %v174_v34, %v174_v34 }
 0x270   :  { %545 = vmatmul.mubr.msk.bf16.vlgmr.msra.gmra.mrb[4].mxu0 %vm212_vm3, %v175_v36 }
 0x271   :  { %549 = vmatpush3.bf16.msra.mxu0 %v595_v35  ;;  %556 = vmatprep.mubr.msk.bf16.mxu0 %vm759_vm0, %v758_v0 }
 0x272   :  { %550 = vmatprep.subr.bf16.mxu0 %v758_v0 }
 0x275   :  { %551 = vmatpush3.bf16.msra.mxu0 %v596_v37 }
 0x276   :  { %552 = vmatprep.subr.bf16.mxu0 %v758_v0 }
 0x279   :  { %553 = vmatpush3.bf16.msra.mxu0 %v597_v38 }
 0x27a   :  { %554 = vmatprep.subr.bf16.mxu0 %v758_v0  ;;  %v381_v0 = vsub.s32 7, %v877_v5 }
 0x27c   :  { %v382_v21 = vrot.slane %v883_v7, %v381_v0 }
 0x27d   :  { %555 = vmatpush3.bf16.msra.mxu0 %v598_v39 }
 0x343   :  { %v250_v42 = vpop.f32.mrb[4].mxu0 }
 0x344   :  { %v251_v43 = vadd.f32 %v250_v42, %v187_v41  ;;  %v546_v44 = vpop.f32.mrb[5].mxu0 }
 0x345   :  { %v253_v45 = vpop.f32.mrb[6].mxu0 }
 0x346   :  { %v256_v46 = vadd.f32 %v251_v43, %v145_v10  ;;  %v547_v47 = vpop.f32.mrb[7].mxu0 }
 0x348   :  { %v257_v48 = vpack.c.bf16 %v256_v46, %v256_v46 }
 0x34a   :  { %557 = vmatmul.mubr.msk.bf16.vlgmr.msra.gmra.mrb[8].mxu0 %vm212_vm3, %v257_v48 }
 0x41d   :  { %v331_v51 = vpop.f32.mrb[8].mxu0 }
 0x41e   :  { %v332_v52 = vadd.f32 %v331_v51, %v269_v50  ;;  %v558_v53 = vpop.f32.mrb[9].mxu0 }
 0x41f   :  { %v334_v54 = vpop.f32.mrb[10].mxu0 }
 0x420   :  { %v559_v55 = vpop.f32.mrb[11].mxu0  ;;  %v338_v56 = vsel %vm337_vm4, %v332_v52, 0.0 }
 0x421   :  { %339 = vadd.xlane.f32.xlu1 %v338_v56 }
 0x4ae   :  { %v340_v59 = vpop.xlane.xlu1 %339 }
 0x4af   :  { %v342_v60 = vmul.f32 0.0078125, %v340_v59 }
 0x4b1   :  { %v343_v61 = vsub.f32 %v332_v52, %v342_v60 }
 0x4b3   :  { %v344_v62 = vmul.f32 %v343_v61, %v343_v61 }
 0x4b5   :  { %v345_v63 = vsel %vm337_vm4, %v344_v62, 0.0 }
 0x4b6   :  { %346 = vadd.xlane.f32.xlu1 %v345_v63 }
 0x543   :  { %v347_v9 = vpop.xlane.xlu1 %346 }
 0x544   :  { %v348_v10 = vmul.f32 0.0078125, %v347_v9 }
 0x546   :  { %v349_v11 = vadd.f32 1e-05, %v348_v10 }
 0x548   :  { %609 = vrsqrt.f32 %v349_v11 }
 0x552   :  { %v610_v15 = vpop.eup %609 }
 0x553   :  { %v351_v16 = vmul.f32 %v610_v15, %v343_v61 }
 0x555   :  { %v356_v18 = vmul.f32 %v355_v14, %v351_v16 }
 0x557   :  { %v361_v19 = vadd.f32 %v360_v17, %v356_v18 }
 0x559   :  { %v362_v20 = vpack.c.bf16 %v361_v19, %v361_v19 }
 0x55b   :  { %577 = vmatmul.mubr.bf16.vlgmr.msra.gmra.mrb[0].mxu1 %v362_v20 }
 0x62e   :  { %v465_v22 = vpop.f32.mrb[0].mxu1 }
 0x62f   :  { %v466_v23 = vadd.f32 %v465_v22, %v382_v21  ;;  %v578_v24 = vpop.f32.mrb[1].mxu1 }
 0x630   :  { %v468_v25 = vpop.f32.mrb[2].mxu1 }
 0x631   :  { %471 = vst [vmem:[#allocation11] sm:$0x3] %v466_v23  ;;  %v579_v26 = vpop.f32.mrb[3].mxu1 }
 0x632   :  { %732 = shalt.err (!%p729_p2)
}
 0x633   :  { %s733_s12 = scalar_lea.hbm %s938_s6, 32 }
 0x634   :  { %p734_p3 = scmp.ne.s32.totalorder %s938_s6, %s733_s12  ;;  %p737_p4 = scmp.lt.u32.totalorder %s733_s12, %s938_s6 }
 0x636   :  { %p739_p5 = pnand %p737_p4, %p734_p3 }
 0x638   :  { %742 = shalt.err (!%p739_p5)
}
 0x639   :  { %481 = dma.vmem_to_hbm [thread:$0]  %s479_s8, 32, %s938_s6, [#allocation4]  }
 0x63a   :  { %749 = dma.done.wait [#allocation4], 32  }
 0x63b   :  { %750 = vsyncadd [#allocation4], 4294967264 }
 0x63c   :  { %485 = vsyncpa [#allocation3], 1 }
 0x63d   :  { %486 = vsyncpa [#allocation6], 1 }
 0x63e   :  { %487 = vsyncpa [#allocation9], 1 }
 0x63f   :  { %488 = vsyncpa [#allocation4], 1 }

</bundles_post_ra>
